<compile_context>
chip_gen: v5e
topology: v5e:2x2
jax: 0.10.0
libtpu: 0.0.40
codegen_flags: <defaults>
</compile_context>

<pallas_src>
import jax
import jax.numpy as jnp
from jax.experimental import pallas as pl
from jax.experimental.pallas import tpu as pltpu

FEATURES = 100          # logical feature width of every Linear
F_PAD = 128             # lane-aligned padded width
NUM_LAYERS = 8
# ReLU applied after these linears in the original 8-layer chain (0-indexed).
RELU_AFTER = (False, True, True, False, True, True, False, False)

# Host-side fusion plan: adjacent linears with NO ReLU between them compose as
#   y @ Wa + ba, then @ Wb + bb  ==  y @ (Wa @ Wb) + (ba @ Wb + bb)
# Groups (0,1), (3,4), (6,7) fuse; layers 2 and 5 stay -> 5 matmuls total.
FUSE_GROUPS = ((0, 1), (2,), (3, 4), (5,), (6, 7))
RELU_AFTER_FUSED = (True, True, True, True, False)
NUM_FUSED = len(FUSE_GROUPS)


def composite_mlp_kernel(x_ref, w_ref, b_ref, o_ref):
    """Fused 5-layer Linear(+bias)(+optional ReLU) chain on one batch tile.

    x_ref: (TM, 128)       activations tile (f32)
    w_ref: (5, 128, 128)   fused weights, (in, out) layout, VMEM-resident
    b_ref: (5, 1, 128)     fused biases
    o_ref: (TM, 128)       output tile
    """
    y = x_ref[...]
    # Static Python loop -> fully unrolled: 5 MXU matmuls + bias adds + ReLUs.
    for i in range(NUM_FUSED):
        y = jnp.dot(y, w_ref[i], preferred_element_type=jnp.float32) + b_ref[i]
        if RELU_AFTER_FUSED[i]:
            y = jnp.maximum(y, 0.0)
    o_ref[...] = y.astype(o_ref.dtype)


def prepare_params(weights, biases):
    """Pad + fuse PyTorch-style params on the host.

    weights: list of 8 arrays, each (out, in) = (100, 100)   (nn.Linear layout)
    biases:  list of 8 arrays, each (100,)
    Returns:
      w_fused: (5, 128, 128) f32, transposed to (in, out) and zero-padded
      b_fused: (5, 1, 128)   f32, zero-padded
    """
    wt, bt = [], []
    for w, b in zip(weights, biases):
        w_pad = jnp.zeros((F_PAD, F_PAD), jnp.float32).at[:FEATURES, :FEATURES].set(w.T)
        b_pad = jnp.zeros((F_PAD,), jnp.float32).at[:FEATURES].set(b)
        wt.append(w_pad)
        bt.append(b_pad)

    ws, bs = [], []
    for group in FUSE_GROUPS:
        w_f = wt[group[0]]
        b_f = bt[group[0]]
        for j in group[1:]:
            b_f = b_f @ wt[j] + bt[j]
            w_f = w_f @ wt[j]
        ws.append(w_f)
        bs.append(b_f.reshape(1, F_PAD))
    return jnp.stack(ws, axis=0), jnp.stack(bs, axis=0)


def composite_model_forward(x, w_fused, b_fused, *, batch_tile=512):
    """x: (B, 100) f32. w_fused: (5, 128, 128). b_fused: (5, 1, 128). Returns (B, 100)."""
    B, F = x.shape
    assert F == FEATURES

    # Batch tile: large batches use `batch_tile` rows; small batches round up to
    # the 8-row sublane multiple so we still satisfy the (8, 128) block rule.
    tm = batch_tile if B >= batch_tile else max(8, ((B + 7) // 8) * 8)
    b_pad = pl.cdiv(B, tm) * tm

    # Zero-pad batch rows and the feature axis (100 -> 128 lanes). Padded weight
    # rows/cols and biases are zero, so padded lanes stay exactly 0 end-to-end.
    x_pad = jnp.zeros((b_pad, F_PAD), jnp.float32).at[:B, :FEATURES].set(x)

    grid = (b_pad // tm,)
    flops = 2 * b_pad * F_PAD * F_PAD * NUM_FUSED
    bytes_accessed = 4 * (2 * b_pad * F_PAD + w_fused.size + b_fused.size)

    out_pad = pl.pallas_call(
        composite_mlp_kernel,
        out_shape=jax.ShapeDtypeStruct((b_pad, F_PAD), jnp.float32),
        grid_spec=pltpu.PrefetchScalarGridSpec(
            num_scalar_prefetch=0,
            grid=grid,
            in_specs=[
                # Activations: tiled over batch (double-buffered by the pipeline).
                pl.BlockSpec((tm, F_PAD), lambda i: (i, 0)),
                # Weights / biases: constant index_map -> fetched once, then
                # VMEM-resident across every grid step.
                pl.BlockSpec((NUM_FUSED, F_PAD, F_PAD), lambda i: (0, 0, 0)),
                pl.BlockSpec((NUM_FUSED, 1, F_PAD), lambda i: (0, 0, 0)),
            ],
            out_specs=pl.BlockSpec((tm, F_PAD), lambda i: (i, 0)),
        ),
        compiler_params=pltpu.CompilerParams(
            # Batch tiles are independent -> shard across v7x's two TensorCores;
            # harmless no-op on single-TC v5e/v6e.
            dimension_semantics=("parallel",),
        ),
        cost_estimate=pl.CostEstimate(
            flops=flops, transcendentals=0, bytes_accessed=bytes_accessed),
    )(x_pad, w_fused, b_fused)

    return out_pad[:B, :FEATURES]


def init_params(key):
    """Deterministic init mimicking nn.Linear's uniform(-1/sqrt(in), 1/sqrt(in)).

    Returns PyTorch-layout params: 8 weights of shape (out, in) and 8 biases (out,).
    """
    bound = 1.0 / jnp.sqrt(jnp.float32(FEATURES))
    weights, biases = [], []
    for _ in range(NUM_LAYERS):
        kw, kb, key = jax.random.split(key, 3)
        weights.append(
            jax.random.uniform(kw, (FEATURES, FEATURES), jnp.float32, -bound, bound))
        biases.append(
            jax.random.uniform(kb, (FEATURES,), jnp.float32, -bound, bound))
    return weights, biases


def reference_forward(x, weights, biases):
    """Pure-JAX reference replicating the PyTorch forward layer-by-layer (unfused)."""
    y = x
    for i in range(NUM_LAYERS):
        y = y @ weights[i].T + biases[i]
        if RELU_AFTER[i]:
            y = jnp.maximum(y, 0.0)
    return y


if __name__ == "__main__":
    key = jax.random.PRNGKey(0)
    kx, kx2, kp = jax.random.split(key, 3)

    weights, biases = init_params(kp)
    w_fused, b_fused = prepare_params(weights, biases)

    # Small-shape check (single 8-row tile).
    B = 8
    x = jax.random.normal(kx, (B, FEATURES), jnp.float32)
    out = composite_model_forward(x, w_fused, b_fused)
    out = jax.block_until_ready(out)
    ref = reference_forward(x, weights, biases)
    assert out.shape == (B, FEATURES)
    assert jnp.allclose(out, ref, atol=1e-4, rtol=1e-4), (
        f"mismatch vs reference (B=8), max_abs_err={jnp.max(jnp.abs(out - ref))}")

    # Multi-tile check: exercises the batch grid, batch padding and slicing.
    B2 = 200
    x2 = jax.random.normal(kx2, (B2, FEATURES), jnp.float32)
    out2 = composite_model_forward(x2, w_fused, b_fused, batch_tile=64)  # grid = (4,)
    out2 = jax.block_until_ready(out2)
    ref2 = reference_forward(x2, weights, biases)
    assert out2.shape == (B2, FEATURES)
    assert jnp.allclose(out2, ref2, atol=1e-4, rtol=1e-4), (
        f"mismatch vs reference (B=200), max_abs_err={jnp.max(jnp.abs(out2 - ref2))}")

    print("KERNEL_OK")
</pallas_src>

<mosaic_0001>
module attributes {stable_mosaic.version = 11 : i64} {
  func.func @composite_mlp_kernel(%arg0: i32, %arg1: memref<8x128xf32, #tpu.memory_space<vmem>>, %arg2: memref<5x128x128xf32, #tpu.memory_space<vmem>>, %arg3: memref<5x1x128xf32, #tpu.memory_space<vmem>>, %arg4: memref<8x128xf32, #tpu.memory_space<vmem>>) attributes {dimension_semantics = [#tpu.dimension_semantics<parallel>], iteration_bounds = array<i64: 1>, scalar_prefetch = 0 : i64, scratch_operands = 0 : i64, tpu.core_type = #tpu.core_type<tc>, window_params = [{transform_indices = @transform_0, window_bounds = array<i64: 8, 128>}, {pipeline_mode = #tpu.pipeline_mode<synchronous>, transform_indices = @transform_1, window_bounds = array<i64: 5, 128, 128>}, {pipeline_mode = #tpu.pipeline_mode<synchronous>, transform_indices = @transform_2, window_bounds = array<i64: 5, 1, 128>}, {transform_indices = @transform_3, window_bounds = array<i64: 8, 128>}]} {
    %c0 = arith.constant 0 : index
    %c0_0 = arith.constant 0 : index
    %0 = vector.load %arg1[%c0, %c0_0] : memref<8x128xf32, #tpu.memory_space<vmem>>, vector<8x128xf32>
    %c0_1 = arith.constant 0 : index
    %c0_2 = arith.constant 0 : index
    %c0_3 = arith.constant 0 : index
    %1 = vector.load %arg2[%c0_1, %c0_2, %c0_3] : memref<5x128x128xf32, #tpu.memory_space<vmem>>, vector<1x128x128xf32>
    %2 = vector.shape_cast %1 : vector<1x128x128xf32> to vector<128x128xf32>
    %cst = arith.constant dense<0.000000e+00> : vector<8x128xf32>
    %3 = tpu.matmul %0, %2, %cst {dimension_numbers = #tpu.dot_dimension_numbers<[1], [0], [0], [1], [0, 0, 1, 1], [], []>} : vector<8x128xf32>, vector<128x128xf32>, vector<8x128xf32> -> vector<8x128xf32>
    %c0_4 = arith.constant 0 : index
    %c0_5 = arith.constant 0 : index
    %c0_6 = arith.constant 0 : index
    %4 = vector.load %arg3[%c0_4, %c0_5, %c0_6] : memref<5x1x128xf32, #tpu.memory_space<vmem>>, vector<1x1x128xf32>
    %5 = vector.shape_cast %4 : vector<1x1x128xf32> to vector<1x128xf32>
    %6 = vector.broadcast %5 : vector<1x128xf32> to vector<8x128xf32>
    %7 = arith.addf %3, %6 : vector<8x128xf32>
    %cst_7 = arith.constant 0.000000e+00 : f32
    %8 = vector.broadcast %cst_7 : f32 to vector<8x128xf32>
    %9 = arith.maximumf %7, %8 : vector<8x128xf32>
    %c1 = arith.constant 1 : index
    %c0_8 = arith.constant 0 : index
    %c0_9 = arith.constant 0 : index
    %10 = vector.load %arg2[%c1, %c0_8, %c0_9] : memref<5x128x128xf32, #tpu.memory_space<vmem>>, vector<1x128x128xf32>
    %11 = vector.shape_cast %10 : vector<1x128x128xf32> to vector<128x128xf32>
    %cst_10 = arith.constant dense<0.000000e+00> : vector<8x128xf32>
    %12 = tpu.matmul %9, %11, %cst_10 {dimension_numbers = #tpu.dot_dimension_numbers<[1], [0], [0], [1], [0, 0, 1, 1], [], []>} : vector<8x128xf32>, vector<128x128xf32>, vector<8x128xf32> -> vector<8x128xf32>
    %c1_11 = arith.constant 1 : index
    %c0_12 = arith.constant 0 : index
    %c0_13 = arith.constant 0 : index
    %13 = vector.load %arg3[%c1_11, %c0_12, %c0_13] : memref<5x1x128xf32, #tpu.memory_space<vmem>>, vector<1x1x128xf32>
    %14 = vector.shape_cast %13 : vector<1x1x128xf32> to vector<1x128xf32>
    %15 = vector.broadcast %14 : vector<1x128xf32> to vector<8x128xf32>
    %16 = arith.addf %12, %15 : vector<8x128xf32>
    %cst_14 = arith.constant 0.000000e+00 : f32
    %17 = vector.broadcast %cst_14 : f32 to vector<8x128xf32>
    %18 = arith.maximumf %16, %17 : vector<8x128xf32>
    %c2 = arith.constant 2 : index
    %c0_15 = arith.constant 0 : index
    %c0_16 = arith.constant 0 : index
    %19 = vector.load %arg2[%c2, %c0_15, %c0_16] : memref<5x128x128xf32, #tpu.memory_space<vmem>>, vector<1x128x128xf32>
    %20 = vector.shape_cast %19 : vector<1x128x128xf32> to vector<128x128xf32>
    %cst_17 = arith.constant dense<0.000000e+00> : vector<8x128xf32>
    %21 = tpu.matmul %18, %20, %cst_17 {dimension_numbers = #tpu.dot_dimension_numbers<[1], [0], [0], [1], [0, 0, 1, 1], [], []>} : vector<8x128xf32>, vector<128x128xf32>, vector<8x128xf32> -> vector<8x128xf32>
    %c2_18 = arith.constant 2 : index
    %c0_19 = arith.constant 0 : index
    %c0_20 = arith.constant 0 : index
    %22 = vector.load %arg3[%c2_18, %c0_19, %c0_20] : memref<5x1x128xf32, #tpu.memory_space<vmem>>, vector<1x1x128xf32>
    %23 = vector.shape_cast %22 : vector<1x1x128xf32> to vector<1x128xf32>
    %24 = vector.broadcast %23 : vector<1x128xf32> to vector<8x128xf32>
    %25 = arith.addf %21, %24 : vector<8x128xf32>
    %cst_21 = arith.constant 0.000000e+00 : f32
    %26 = vector.broadcast %cst_21 : f32 to vector<8x128xf32>
    %27 = arith.maximumf %25, %26 : vector<8x128xf32>
    %c3 = arith.constant 3 : index
    %c0_22 = arith.constant 0 : index
    %c0_23 = arith.constant 0 : index
    %28 = vector.load %arg2[%c3, %c0_22, %c0_23] : memref<5x128x128xf32, #tpu.memory_space<vmem>>, vector<1x128x128xf32>
    %29 = vector.shape_cast %28 : vector<1x128x128xf32> to vector<128x128xf32>
    %cst_24 = arith.constant dense<0.000000e+00> : vector<8x128xf32>
    %30 = tpu.matmul %27, %29, %cst_24 {dimension_numbers = #tpu.dot_dimension_numbers<[1], [0], [0], [1], [0, 0, 1, 1], [], []>} : vector<8x128xf32>, vector<128x128xf32>, vector<8x128xf32> -> vector<8x128xf32>
    %c3_25 = arith.constant 3 : index
    %c0_26 = arith.constant 0 : index
    %c0_27 = arith.constant 0 : index
    %31 = vector.load %arg3[%c3_25, %c0_26, %c0_27] : memref<5x1x128xf32, #tpu.memory_space<vmem>>, vector<1x1x128xf32>
    %32 = vector.shape_cast %31 : vector<1x1x128xf32> to vector<1x128xf32>
    %33 = vector.broadcast %32 : vector<1x128xf32> to vector<8x128xf32>
    %34 = arith.addf %30, %33 : vector<8x128xf32>
    %cst_28 = arith.constant 0.000000e+00 : f32
    %35 = vector.broadcast %cst_28 : f32 to vector<8x128xf32>
    %36 = arith.maximumf %34, %35 : vector<8x128xf32>
    %c4 = arith.constant 4 : index
    %c0_29 = arith.constant 0 : index
    %c0_30 = arith.constant 0 : index
    %37 = vector.load %arg2[%c4, %c0_29, %c0_30] : memref<5x128x128xf32, #tpu.memory_space<vmem>>, vector<1x128x128xf32>
    %38 = vector.shape_cast %37 : vector<1x128x128xf32> to vector<128x128xf32>
    %cst_31 = arith.constant dense<0.000000e+00> : vector<8x128xf32>
    %39 = tpu.matmul %36, %38, %cst_31 {dimension_numbers = #tpu.dot_dimension_numbers<[1], [0], [0], [1], [0, 0, 1, 1], [], []>} : vector<8x128xf32>, vector<128x128xf32>, vector<8x128xf32> -> vector<8x128xf32>
    %c4_32 = arith.constant 4 : index
    %c0_33 = arith.constant 0 : index
    %c0_34 = arith.constant 0 : index
    %40 = vector.load %arg3[%c4_32, %c0_33, %c0_34] : memref<5x1x128xf32, #tpu.memory_space<vmem>>, vector<1x1x128xf32>
    %41 = vector.shape_cast %40 : vector<1x1x128xf32> to vector<1x128xf32>
    %42 = vector.broadcast %41 : vector<1x128xf32> to vector<8x128xf32>
    %43 = arith.addf %39, %42 : vector<8x128xf32>
    %c0_35 = arith.constant 0 : index
    %c0_36 = arith.constant 0 : index
    %44 = vector.load %arg4[%c0_35, %c0_36] : memref<8x128xf32, #tpu.memory_space<vmem>>, vector<8x128xf32>
    tpu.vector_store %arg4[%c0_35, %c0_36], %43 {strides = array<i32>} : memref<8x128xf32, #tpu.memory_space<vmem>>, vector<8x128xf32>,
    return
  }
  func.func @transform_0(%arg0: i32) -> (i32, i32) {
    %c0_i32 = arith.constant 0 : i32
    %c0_i32_0 = arith.constant 0 : i32
    return %arg0, %c0_i32 : i32, i32
  }
  func.func @transform_1(%arg0: i32) -> (i32, i32, i32) {
    %c0_i32 = arith.constant 0 : i32
    %c0_i32_0 = arith.constant 0 : i32
    %c0_i32_1 = arith.constant 0 : i32
    %c0_i32_2 = arith.constant 0 : i32
    return %c0_i32, %c0_i32_0, %c0_i32_1 : i32, i32, i32
  }
  func.func @transform_2(%arg0: i32) -> (i32, i32, i32) {
    %c0_i32 = arith.constant 0 : i32
    %c0_i32_0 = arith.constant 0 : i32
    %c0_i32_1 = arith.constant 0 : i32
    %c0_i32_2 = arith.constant 0 : i32
    return %c0_i32, %c0_i32_0, %c0_i32_1 : i32, i32, i32
  }
  func.func @transform_3(%arg0: i32) -> (i32, i32) {
    %c0_i32 = arith.constant 0 : i32
    %c0_i32_0 = arith.constant 0 : i32
    return %arg0, %c0_i32 : i32, i32
  }
}

</mosaic_0001>

<bundles_post_ra>
// kernel: tpu_custom_call.1
= control target key start
LH: loop header
LB: loop body
LE: loop exit
PB: predicated region body
PF: predicated region fallthrough
CT: control target
= control target key end

     0   :  { %8 = vsyncpa [#allocation3], 0  ;;  %s447_s0 = inlined_call_operand.hbm [shape: f32[8,128], index: 0, kind: input, shape index: {}]   ;;  %s448_s1 = inlined_call_operand.hbm [shape: f32[5,128,128], index: 1, kind: input, shape index: {}]   ;;  %s449_s2 = inlined_call_operand.hbm [shape: f32[5,1,128], index: 2, kind: input, shape index: {}]   ;;  %s450_s3 = inlined_call_operand.hbm [shape: f32[8,128], index: 3, kind: output, shape index: {}]  }
   0x1   :  { %9 = vsyncpa [#allocation6], 0  ;;  %s26_s14 = sshll.u32 %s448_s1, 4  ;;  %s27_s14 = int_to_ptr.hbm [resolvable:$true] %s26_s14 }
   0x2   :  { %10 = vsyncpa [#allocation4], 0  ;;  %s407_s15 = smov [#allocation5]   ;;  %s16_s19 = sshll.u32 %s447_s0, 4  ;;  %s17_s19 = int_to_ptr.hbm [resolvable:$true] %s16_s19 }
   0x3   :  { %s28_s16 = sshll.u32 %s407_s15, 4  ;;  %s408_s20 = smov 128   ;;  %s29_s16 = int_to_ptr.vmem [resolvable:$true] %s28_s16 }
   0x4   :  { %s409_s21 = smov 8   ;;  %s410_s22 = smov [#allocation2]  }
   0x5   :  { %34 = dma.hbm_to_vmem [thread:$0]  %s27_s14, 10240, %s29_s16, [#allocation6], %s408_s20, %s408_s20, %s409_s21  }
   0x6   :  { %s18_s23 = sshll.u32 %s410_s22, 4  ;;  %s39_s26 = sshll.u32 %s449_s2, 4  ;;  %s19_s23 = int_to_ptr.vmem [resolvable:$true] %s18_s23  ;;  %s40_s26 = int_to_ptr.hbm [resolvable:$true] %s39_s26 }
   0x7   :  { %21 = dma.hbm_to_vmem [thread:$0]  %s17_s19, 128, %s19_s23, [#allocation3]  }
   0x8   :  { %s411_s1 = smov [#allocation7]   ;;  %s412_s28 = smov 16  }
   0x9   :  { %s41_s27 = sshll.u32 %s411_s1, 4  ;;  %s413_s29 = smov 1   ;;  %s42_s27 = int_to_ptr.vmem [resolvable:$true] %s41_s27 }
   0xa   :  { %47 = dma.hbm_to_vmem [thread:$0]  %s40_s26, 80, %s42_s27, [#allocation6], %s412_s28, %s412_s28, %s413_s29  }
   0xb   :  { %401 = dma.done.wait [#allocation3], 128  }
   0xc   :  { %402 = vsyncadd [#allocation3], 4294967168 }
   0xd   :  { %403 = dma.done.wait [#allocation6], 10320  }
   0xe   :  { %404 = vsyncadd [#allocation6], 4294956976  ;;  %v76_v0 = vld [vmem:[#allocation5 + $0x78] sm:$0xff]  ;;  %v75_v1 = vld [vmem:[#allocation5 + $0x70] sm:$0xff]  ;;  %s414_s0 = smov [#allocation8]   ;;  %s281_s5 = sshll.u32 %s450_s3, 4  ;;  %s282_s5 = int_to_ptr.hbm [resolvable:$true] %s281_s5 }
   0xf   :  { %81 = vmatpush.msra.mxu0 %v76_v0  ;;  %v74_v2 = vld [vmem:[#allocation5 + $0x68] sm:$0xff]  ;;  %v73_v3 = vld [vmem:[#allocation5 + $0x60] sm:$0xff]  ;;  %v118_v4 = vld [vmem:[#allocation5 + $0xf8] sm:$0xff]  ;;  %s279_s2 = sshll.u32 %s414_s0, 4  ;;  %s280_s2 = int_to_ptr.vmem [resolvable:$true] %s279_s2 }
  0x10   :  { %v72_v5 = vld [vmem:[#allocation5 + $0x58] sm:$0xff]  ;;  %124 = vmatpush.msra.mxu1 %v118_v4  ;;  %v117_v6 = vld [vmem:[#allocation5 + $0xf0] sm:$0xff]  ;;  %v116_v7 = vld [vmem:[#allocation5 + $0xe8] sm:$0xff] }
  0x11   :  { %82 = vmatpush.msra.mxu0 %v75_v1  ;;  %v71_v8 = vld [vmem:[#allocation5 + $0x50] sm:$0xff]  ;;  %v70_v9 = vld [vmem:[#allocation5 + $0x48] sm:$0xff]  ;;  %v115_v10 = vld [vmem:[#allocation5 + $0xe0] sm:$0xff] }
  0x12   :  { %125 = vmatpush.msra.mxu1 %v117_v6  ;;  %v114_v11 = vld [vmem:[#allocation5 + $0xd8] sm:$0xff]  ;;  %v69_v12 = vld [vmem:[#allocation5 + $0x40] sm:$0xff]  ;;  %v113_v13 = vld [vmem:[#allocation5 + $0xd0] sm:$0xff] }
  0x13   :  { %83 = vmatpush.msra.mxu0 %v74_v2  ;;  %v68_v14 = vld [vmem:[#allocation5 + $0x38] sm:$0xff]  ;;  %v112_v15 = vld [vmem:[#allocation5 + $0xc8] sm:$0xff]  ;;  %v67_v16 = vld [vmem:[#allocation5 + $0x30] sm:$0xff] }
  0x14   :  { %126 = vmatpush.msra.mxu1 %v116_v7  ;;  %v111_v17 = vld [vmem:[#allocation5 + $0xc0] sm:$0xff]  ;;  %v66_v18 = vld [vmem:[#allocation5 + $0x28] sm:$0xff]  ;;  %v110_v19 = vld [vmem:[#allocation5 + $0xb8] sm:$0xff] }
  0x15   :  { %84 = vmatpush.msra.mxu0 %v73_v3  ;;  %v65_v20 = vld [vmem:[#allocation5 + $0x20] sm:$0xff]  ;;  %v109_v21 = vld [vmem:[#allocation5 + $0xb0] sm:$0xff]  ;;  %v64_v22 = vld [vmem:[#allocation5 + $0x18] sm:$0xff] }
  0x16   :  { %127 = vmatpush.msra.mxu1 %v115_v10  ;;  %v108_v23 = vld [vmem:[#allocation5 + $0xa8] sm:$0xff]  ;;  %v63_v24 = vld [vmem:[#allocation5 + $0x10] sm:$0xff]  ;;  %v107_v25 = vld [vmem:[#allocation5 + $0xa0] sm:$0xff] }
  0x17   :  { %85 = vmatpush.msra.mxu0 %v72_v5  ;;  %v62_v26 = vld [vmem:[#allocation5 + $0x8] sm:$0xff]  ;;  %v106_v27 = vld [vmem:[#allocation5 + $0x98] sm:$0xff]  ;;  %v61_v28 = vld [vmem:[#allocation5] sm:$0xff] }
  0x18   :  { %128 = vmatpush.msra.mxu1 %v114_v11  ;;  %v60_v29 = vld [vmem:[#allocation2] sm:$0xff]  ;;  %v105_v30 = vld [vmem:[#allocation5 + $0x90] sm:$0xff]  ;;  %v104_v31 = vld [vmem:[#allocation5 + $0x88] sm:$0xff] }
  0x19   :  { %86 = vmatpush.msra.mxu0 %v71_v8  ;;  %v103_v32 = vld [vmem:[#allocation5 + $0x80] sm:$0xff]  ;;  %v161_v33 = vld [vmem:[#allocation5 + $0x178] sm:$0xff]  ;;  %v160_v34 = vld [vmem:[#allocation5 + $0x170] sm:$0xff] }
  0x1a   :  { %129 = vmatpush.msra.mxu1 %v113_v13  ;;  %167 = vmatpush.msra.mxu2 %v161_v33  ;;  %v159_v35 = vld [vmem:[#allocation5 + $0x168] sm:$0xff]  ;;  %v158_v36 = vld [vmem:[#allocation5 + $0x160] sm:$0xff]  ;;  %v157_v37 = vld [vmem:[#allocation5 + $0x158] sm:$0xff] }
  0x1b   :  { %87 = vmatpush.msra.mxu0 %v70_v9  ;;  %v156_v38 = vld [vmem:[#allocation5 + $0x150] sm:$0xff]  ;;  %v155_v39 = vld [vmem:[#allocation5 + $0x148] sm:$0xff]  ;;  %v154_v40 = vld [vmem:[#allocation5 + $0x140] sm:$0xff] }
  0x1c   :  { %130 = vmatpush.msra.mxu1 %v112_v15  ;;  %168 = vmatpush.msra.mxu2 %v160_v34  ;;  %v153_v41 = vld [vmem:[#allocation5 + $0x138] sm:$0xff]  ;;  %v152_v42 = vld [vmem:[#allocation5 + $0x130] sm:$0xff]  ;;  %v151_v43 = vld [vmem:[#allocation5 + $0x128] sm:$0xff] }
  0x1d   :  { %88 = vmatpush.msra.mxu0 %v69_v12  ;;  %v150_v44 = vld [vmem:[#allocation5 + $0x120] sm:$0xff]  ;;  %v149_v45 = vld [vmem:[#allocation5 + $0x118] sm:$0xff]  ;;  %v148_v50 = vld [vmem:[#allocation5 + $0x110] sm:$0xff] }
  0x1e   :  { %131 = vmatpush.msra.mxu1 %v111_v17  ;;  %169 = vmatpush.msra.mxu2 %v159_v35  ;;  %v300_v46 = vld [vmem:[#allocation7] ss:$0 sm:$0xff]  ;;  %v147_v51 = vld [vmem:[#allocation5 + $0x108] sm:$0xff]  ;;  %v204_v53 = vld [vmem:[#allocation5 + $0x1f8] sm:$0xff] }
  0x1f   :  { %89 = vmatpush.msra.mxu0 %v68_v14  ;;  %v146_v52 = vld [vmem:[#allocation5 + $0x100] sm:$0xff]  ;;  %v203_v54 = vld [vmem:[#allocation5 + $0x1f0] sm:$0xff]  ;;  %210 = vmatpush.msra.mxu3 %v204_v53  ;;  %v202_v55 = vld [vmem:[#allocation5 + $0x1e8] sm:$0xff] }
  0x20   :  { %132 = vmatpush.msra.mxu1 %v110_v19  ;;  %170 = vmatpush.msra.mxu2 %v158_v36  ;;  %v201_v56 = vld [vmem:[#allocation5 + $0x1e0] sm:$0xff]  ;;  %v200_v57 = vld [vmem:[#allocation5 + $0x1d8] sm:$0xff]  ;;  %v199_v58 = vld [vmem:[#allocation5 + $0x1d0] sm:$0xff] }
  0x21   :  { %90 = vmatpush.msra.mxu0 %v67_v16  ;;  %211 = vmatpush.msra.mxu3 %v203_v54  ;;  %v198_v59 = vld [vmem:[#allocation5 + $0x1c8] sm:$0xff]  ;;  %v197_v60 = vld [vmem:[#allocation5 + $0x1c0] sm:$0xff]  ;;  %v196_v61 = vld [vmem:[#allocation5 + $0x1b8] sm:$0xff] }
  0x22   :  { %133 = vmatpush.msra.mxu1 %v109_v21  ;;  %171 = vmatpush.msra.mxu2 %v157_v37  ;;  %v195_v62 = vld [vmem:[#allocation5 + $0x1b0] sm:$0xff]  ;;  %v194_v63 = vld [vmem:[#allocation5 + $0x1a8] sm:$0xff]  ;;  %v193_v0 = vld [vmem:[#allocation5 + $0x1a0] sm:$0xff] }
  0x23   :  { %91 = vmatpush.msra.mxu0 %v66_v18  ;;  %212 = vmatpush.msra.mxu3 %v202_v55  ;;  %v192_v1 = vld [vmem:[#allocation5 + $0x198] sm:$0xff]  ;;  %v301_v2 = vld [vmem:[#allocation7 + $0x1] ss:$0 sm:$0xff]  ;;  %v191_v6 = vld [vmem:[#allocation5 + $0x190] sm:$0xff] }
  0x24   :  { %134 = vmatpush.msra.mxu1 %v108_v23  ;;  %172 = vmatpush.msra.mxu2 %v156_v38  ;;  %v190_v7 = vld [vmem:[#allocation5 + $0x188] sm:$0xff]  ;;  %v189_v8 = vld [vmem:[#allocation5 + $0x180] sm:$0xff]  ;;  %v247_v9 = vld [vmem:[#allocation5 + $0x278] sm:$0xff] }
  0x25   :  { %92 = vmatpush.msra.mxu0 %v65_v20  ;;  %213 = vmatpush.msra.mxu3 %v201_v56  ;;  %v246_v10 = vld [vmem:[#allocation5 + $0x270] sm:$0xff]  ;;  %v245_v11 = vld [vmem:[#allocation5 + $0x268] sm:$0xff]  ;;  %v244_v12 = vld [vmem:[#allocation5 + $0x260] sm:$0xff] }
  0x26   :  { %135 = vmatpush.msra.mxu1 %v107_v25  ;;  %173 = vmatpush.msra.mxu2 %v155_v39  ;;  %v243_v13 = vld [vmem:[#allocation5 + $0x258] sm:$0xff]  ;;  %v242_v14 = vld [vmem:[#allocation5 + $0x250] sm:$0xff]  ;;  %v241_v15 = vld [vmem:[#allocation5 + $0x248] sm:$0xff] }
  0x27   :  { %93 = vmatpush.msra.mxu0 %v64_v22  ;;  %214 = vmatpush.msra.mxu3 %v200_v57  ;;  %v240_v16 = vld [vmem:[#allocation5 + $0x240] sm:$0xff]  ;;  %v239_v17 = vld [vmem:[#allocation5 + $0x238] sm:$0xff]  ;;  %v238_v18 = vld [vmem:[#allocation5 + $0x230] sm:$0xff] }
  0x28   :  { %136 = vmatpush.msra.mxu1 %v106_v27  ;;  %174 = vmatpush.msra.mxu2 %v154_v40  ;;  %v237_v19 = vld [vmem:[#allocation5 + $0x228] sm:$0xff]  ;;  %v236_v20 = vld [vmem:[#allocation5 + $0x220] sm:$0xff]  ;;  %v235_v21 = vld [vmem:[#allocation5 + $0x218] sm:$0xff] }
  0x29   :  { %94 = vmatpush.msra.mxu0 %v63_v24  ;;  %215 = vmatpush.msra.mxu3 %v199_v58  ;;  %v302_v22 = vld [vmem:[#allocation7 + $0x2] ss:$0 sm:$0xff]  ;;  %v233_v27 = vld [vmem:[#allocation5 + $0x208] sm:$0xff]  ;;  %v304_v33 = vld [vmem:[#allocation7 + $0x4] ss:$0 sm:$0xff] }
  0x2a   :  { %137 = vmatpush.msra.mxu1 %v105_v30  ;;  %175 = vmatpush.msra.mxu2 %v153_v41 }
  0x2b   :  { %95 = vmatpush.msra.mxu0 %v62_v26  ;;  %216 = vmatpush.msra.mxu3 %v198_v59  ;;  %v234_v26 = vld [vmem:[#allocation5 + $0x210] sm:$0xff] }
  0x2c   :  { %138 = vmatpush.msra.mxu1 %v104_v31  ;;  %176 = vmatpush.msra.mxu2 %v152_v42 }
  0x2d   :  { %96 = vmatpush.msra.mxu0 %v61_v28  ;;  %217 = vmatpush.msra.mxu3 %v197_v60  ;;  %v232_v28 = vld [vmem:[#allocation5 + $0x200] sm:$0xff] }
  0x2e   :  { %97 = vmatmul.f32.vlgmr.msra.gmra.mxu0 %v60_v29  ;;  %139 = vmatpush.msra.mxu1 %v103_v32  ;;  %v303_v29 = vld [vmem:[#allocation7 + $0x3] ss:$0 sm:$0xff] }
  0x2f   :  { %177 = vmatpush.msra.mxu2 %v151_v43  ;;  %218 = vmatpush.msra.mxu3 %v196_v61 }
  0x30   :  { %253 = vmatpush.msrb.mxu0 %v247_v9 }
  0x31   :  { %178 = vmatpush.msra.mxu2 %v150_v44  ;;  %219 = vmatpush.msra.mxu3 %v195_v62 }
  0x32   :  { %254 = vmatpush.msrb.mxu0 %v246_v10 }
  0x33   :  { %179 = vmatpush.msra.mxu2 %v149_v45  ;;  %220 = vmatpush.msra.mxu3 %v194_v63 }
  0x34   :  { %255 = vmatpush.msrb.mxu0 %v245_v11 }
  0x35   :  { %180 = vmatpush.msra.mxu2 %v148_v50  ;;  %221 = vmatpush.msra.mxu3 %v193_v0 }
  0x36   :  { %256 = vmatpush.msrb.mxu0 %v244_v12 }
  0x37   :  { %181 = vmatpush.msra.mxu2 %v147_v51  ;;  %222 = vmatpush.msra.mxu3 %v192_v1 }
  0x38   :  { %257 = vmatpush.msrb.mxu0 %v243_v13 }
  0x39   :  { %182 = vmatpush.msra.mxu2 %v146_v52  ;;  %223 = vmatpush.msra.mxu3 %v191_v6 }
  0x3a   :  { %258 = vmatpush.msrb.mxu0 %v242_v14 }
  0x3b   :  { %224 = vmatpush.msra.mxu3 %v190_v7 }
  0x3c   :  { %259 = vmatpush.msrb.mxu0 %v241_v15 }
  0x3d   :  { %225 = vmatpush.msra.mxu3 %v189_v8 }
  0x3e   :  { %260 = vmatpush.msrb.mxu0 %v240_v16 }
  0x40   :  { %261 = vmatpush.msrb.mxu0 %v239_v17 }
  0x42   :  { %262 = vmatpush.msrb.mxu0 %v238_v18 }
  0x44   :  { %263 = vmatpush.msrb.mxu0 %v237_v19 }
  0x46   :  { %264 = vmatpush.msrb.mxu0 %v236_v20 }
  0x48   :  { %265 = vmatpush.msrb.mxu0 %v235_v21 }
  0x4a   :  { %266 = vmatpush.msrb.mxu0 %v234_v26 }
  0x4c   :  { %267 = vmatpush.msrb.mxu0 %v233_v27 }
  0x4e   :  { %268 = vmatpush.msrb.mxu0 %v232_v28 }
  0xab   :  { %v98_v47 = vpop.f32.mrf.mxu0 }
  0xac   :  { %v99_v48 = vadd.f32 %v300_v46, %v98_v47 }
  0xae   :  { %v101_v49 = vmax.f32 %v99_v48, 0.0 }
  0xb0   :  { %140 = vmatmul.f32.vlgmr.msra.gmra.mxu1 %v101_v49 }
 0x12d   :  { %v141_v3 = vpop.f32.mrf.mxu1 }
 0x12e   :  { %v142_v4 = vadd.f32 %v301_v2, %v141_v3 }
 0x130   :  { %v144_v5 = vmax.f32 %v142_v4, 0.0 }
 0x132   :  { %183 = vmatmul.f32.vlgmr.msra.gmra.mxu2 %v144_v5 }
 0x1b5   :  { %v184_v23 = vpop.f32.mrf.mxu2 }
 0x1b6   :  { %v185_v24 = vadd.f32 %v302_v22, %v184_v23 }
 0x1b8   :  { %v187_v25 = vmax.f32 %v185_v24, 0.0 }
 0x1ba   :  { %226 = vmatmul.f32.vlgmr.msra.gmra.mxu3 %v187_v25 }
 0x23d   :  { %v227_v30 = vpop.f32.mrf.mxu3 }
 0x23e   :  { %v228_v31 = vadd.f32 %v303_v29, %v227_v30 }
 0x240   :  { %v230_v32 = vmax.f32 %v228_v31, 0.0 }
 0x242   :  { %269 = vmatmul.f32.vlgmr.msrb.gmra.mxu0 %v230_v32 }
 0x2bf   :  { %v270_v34 = vpop.f32.mrf.mxu0 }
 0x2c0   :  { %v271_v35 = vadd.f32 %v304_v33, %v270_v34 }
 0x2c2   :  { %273 = vst [vmem:[#allocation8] sm:$0xff] %v271_v35 }
 0x2c3   :  { %284 = dma.vmem_to_hbm [thread:$0]  %s280_s2, 128, %s282_s5, [#allocation4]  }
 0x2c4   :  { %405 = dma.done.wait [#allocation4], 128  }
 0x2c5   :  { %406 = vsyncadd [#allocation4], 4294967168 }
 0x2c6   :  { %289 = vsyncpa [#allocation3], 1 }
 0x2c7   :  { %290 = vsyncpa [#allocation6], 1 }
 0x2c8   :  { %291 = vsyncpa [#allocation4], 1 }

</bundles_post_ra>
